<compile_context>
chip_gen: v7x
topology: tpu7x:2x2x1
jax: 0.10.0
libtpu: 0.0.40
codegen_flags: <defaults>
</compile_context>

<pallas_src>
import functools

import jax
import jax.numpy as jnp
from jax.experimental import pallas as pl
from jax.experimental.pallas import tpu as pltpu

LANES = 128
SUBLANES = 8
MAX_TILE_ROWS = 2048  # 2048 x 128 x 4B = 1 MiB per input block


def _loss_kernel(yp_ref, yt_ref, num_ref, den_ref, *,
                 n_total, tile_rows, blocks_per_core, needs_mask):
    c = pl.program_id(0)   # core split (parallel)
    i = pl.program_id(1)   # row-tile sweep (arbitrary / reduction)

    @pl.when(i == 0)
    def _():
        num_ref[...] = jnp.zeros_like(num_ref)
        den_ref[...] = jnp.zeros_like(den_ref)

    yp = yp_ref[...].astype(jnp.float32)   # (tile_rows, 128)
    yt = yt_ref[...].astype(jnp.float32)

    w = 1.0 / 30.0 + yt
    diff = yp - yt
    wsd = w * diff * diff

    if needs_mask:
        # In-kernel tail mask from the static true element count. Padding
        # elements (flat index >= n_total) must not contribute to either sum
        # (weights = 1/30 + y_true is nonzero even for zero padding).
        blk_elems = tile_rows * LANES
        block_global = c * blocks_per_core + i
        valid_count = jnp.clip(n_total - block_global * blk_elems, 0, blk_elems)
        row_ids = jax.lax.broadcasted_iota(jnp.int32, (tile_rows, LANES), 0)
        lane_ids = jax.lax.broadcasted_iota(jnp.int32, (tile_rows, LANES), 1)
        valid = (row_ids * LANES + lane_ids) < valid_count
        w = jnp.where(valid, w, 0.0)
        wsd = jnp.where(valid, wsd, 0.0)

    # Fold (tile_rows,128) -> (8,128) with pure vreg-wise VPU adds and
    # accumulate into the resident output blocks; defer the cross-lane
    # reduction to the wrapper (runs once on a tiny array).
    num_ref[...] += wsd.reshape(tile_rows // SUBLANES, SUBLANES, LANES).sum(axis=0)
    den_ref[...] += w.reshape(tile_rows // SUBLANES, SUBLANES, LANES).sum(axis=0)


@jax.jit
def custom_loss(y_pred, y_true):
    assert y_pred.shape == y_true.shape
    n = int(y_pred.size)

    # ---- Static, balanced tiling derivation (shapes are static under jit) ----
    rows = pl.cdiv(n, LANES)
    rows8 = pl.cdiv(rows, SUBLANES) * SUBLANES            # sublane multiple
    nblocks = pl.cdiv(rows8, MAX_TILE_ROWS)               # min #blocks w/ max tile
    ncores = 2 if nblocks >= 2 else 1                     # megacore split on v7x
    nblocks = pl.cdiv(nblocks, ncores) * ncores           # multiple of ncores
    tile_rows = pl.cdiv(pl.cdiv(rows8, nblocks), SUBLANES) * SUBLANES
    blocks_per_core = nblocks // ncores
    rows_padded = nblocks * tile_rows                      # >= rows8 >= rows
    padded = rows_padded * LANES
    needs_mask = padded != n

    yp = y_pred.reshape(-1)
    yt = y_true.reshape(-1)
    if needs_mask:
        # Tail-only padding (at most ~nblocks*1024 + 1023 elems); masked in-kernel.
        yp = jnp.pad(yp, (0, padded - n))
        yt = jnp.pad(yt, (0, padded - n))
    yp2 = yp.reshape(rows_padded, LANES)
    yt2 = yt.reshape(rows_padded, LANES)

    kernel = functools.partial(
        _loss_kernel, n_total=n, tile_rows=tile_rows,
        blocks_per_core=blocks_per_core, needs_mask=needs_mask)

    in_spec = pl.BlockSpec((tile_rows, LANES),
                           lambda c, i: (c * blocks_per_core + i, 0))
    out_spec = pl.BlockSpec((SUBLANES, LANES), lambda c, i: (c, 0))

    num_part, den_part = pl.pallas_call(
        kernel,
        out_shape=(jax.ShapeDtypeStruct((ncores * SUBLANES, LANES), jnp.float32),
                   jax.ShapeDtypeStruct((ncores * SUBLANES, LANES), jnp.float32)),
        grid_spec=pltpu.PrefetchScalarGridSpec(
            num_scalar_prefetch=0,
            grid=(ncores, blocks_per_core),
            in_specs=[in_spec, in_spec],
            out_specs=[out_spec, out_spec],
        ),
        compiler_params=pltpu.CompilerParams(
            dimension_semantics=("parallel", "arbitrary")),
    )(yp2, yt2)

    # Single tiny cross-lane/sublane reduction outside the kernel.
    return jnp.sum(num_part) / jnp.sum(den_part)


def _reference_loss(y_pred, y_true):
    w = 1.0 / 30.0 + y_true
    sd = (y_pred - y_true) ** 2
    return jnp.sum(w * sd) / jnp.sum(w)


if __name__ == "__main__":
    key = jax.random.PRNGKey(0)

    # 1) Canonical small NCHW case (no padding path, single block).
    # 2) Ragged element count (exercises tail mask + pad path).
    # 3) Moderate size (exercises multi-block grid + 2-way parallel axis,
    #    balanced tiling with zero padding).
    shapes = [(2, 4, 16, 16), (3, 5, 7, 11), (8, 16, 48, 48)]
    for shape in shapes:
        key, k1, k2 = jax.random.split(key, 3)
        y_pred = jax.random.normal(k1, shape, dtype=jnp.float32)
        y_true = jax.random.uniform(k2, shape, dtype=jnp.float32)

        loss = custom_loss(y_pred, y_true)
        jax.block_until_ready(loss)

        ref = _reference_loss(y_pred, y_true)
        assert jnp.allclose(loss, ref, rtol=1e-5, atol=1e-6), (shape, loss, ref)

    print("KERNEL_OK")
</pallas_src>

<mosaic_0001>
module attributes {stable_mosaic.version = 11 : i64} {
  func.func @_loss_kernel(%arg0: i32, %arg1: i32, %arg2: memref<16x128xf32, #tpu.memory_space<vmem>>, %arg3: memref<16x128xf32, #tpu.memory_space<vmem>>, %arg4: memref<8x128xf32, #tpu.memory_space<vmem>>, %arg5: memref<8x128xf32, #tpu.memory_space<vmem>>) attributes {dimension_semantics = [#tpu.dimension_semantics<parallel>, #tpu.dimension_semantics<arbitrary>], iteration_bounds = array<i64: 1, 1>, scalar_prefetch = 0 : i64, scratch_operands = 0 : i64, tpu.core_type = #tpu.core_type<tc>, window_params = [{transform_indices = @transform_0, window_bounds = array<i64: 16, 128>}, {transform_indices = @transform_1, window_bounds = array<i64: 16, 128>}, {transform_indices = @transform_2, window_bounds = array<i64: 8, 128>}, {transform_indices = @transform_3, window_bounds = array<i64: 8, 128>}]} {
    %c0_i32 = arith.constant 0 : i32
    %0 = arith.cmpi eq, %arg1, %c0_i32 : i32
    %1 = arith.extui %0 : i1 to i32
    %c0_i32_0 = arith.constant 0 : i32
    %2 = arith.cmpi ne, %1, %c0_i32_0 : i32
    scf.if %2 {
      %cst_14 = arith.constant 0.000000e+00 : f32
      %20 = vector.broadcast %cst_14 : f32 to vector<8x128xf32>
      %c0_15 = arith.constant 0 : index
      %c0_16 = arith.constant 0 : index
      %21 = vector.load %arg4[%c0_15, %c0_16] : memref<8x128xf32, #tpu.memory_space<vmem>>, vector<8x128xf32>
      tpu.vector_store %arg4[%c0_15, %c0_16], %20 {strides = array<i32>} : memref<8x128xf32, #tpu.memory_space<vmem>>, vector<8x128xf32>,
      %cst_17 = arith.constant 0.000000e+00 : f32
      %22 = vector.broadcast %cst_17 : f32 to vector<8x128xf32>
      %c0_18 = arith.constant 0 : index
      %c0_19 = arith.constant 0 : index
      %23 = vector.load %arg5[%c0_18, %c0_19] : memref<8x128xf32, #tpu.memory_space<vmem>>, vector<8x128xf32>
      tpu.vector_store %arg5[%c0_18, %c0_19], %22 {strides = array<i32>} : memref<8x128xf32, #tpu.memory_space<vmem>>, vector<8x128xf32>,
    } else {
    }
    %c0 = arith.constant 0 : index
    %c0_1 = arith.constant 0 : index
    %3 = vector.load %arg2[%c0, %c0_1] : memref<16x128xf32, #tpu.memory_space<vmem>>, vector<16x128xf32>
    %c0_2 = arith.constant 0 : index
    %c0_3 = arith.constant 0 : index
    %4 = vector.load %arg3[%c0_2, %c0_3] : memref<16x128xf32, #tpu.memory_space<vmem>>, vector<16x128xf32>
    %cst = arith.constant 0.0333333351 : f32
    %5 = vector.broadcast %cst : f32 to vector<16x128xf32>
    %6 = arith.addf %5, %4 : vector<16x128xf32>
    %7 = arith.subf %3, %4 : vector<16x128xf32>
    %8 = arith.mulf %6, %7 : vector<16x128xf32>
    %9 = arith.mulf %8, %7 : vector<16x128xf32>
    %c0_4 = arith.constant 0 : index
    %c0_5 = arith.constant 0 : index
    %10 = vector.load %arg4[%c0_4, %c0_5] : memref<8x128xf32, #tpu.memory_space<vmem>>, vector<8x128xf32>
    %11 = vector.shape_cast %9 : vector<16x128xf32> to vector<2x8x128xf32>
    %cst_6 = arith.constant dense<0.000000e+00> : vector<8x128xf32>
    %12 = vector.multi_reduction <add>, %11, %cst_6 [0] : vector<2x8x128xf32> to vector<8x128xf32>
    %13 = arith.addf %10, %12 : vector<8x128xf32>
    %c0_7 = arith.constant 0 : index
    %c0_8 = arith.constant 0 : index
    %14 = vector.load %arg4[%c0_7, %c0_8] : memref<8x128xf32, #tpu.memory_space<vmem>>, vector<8x128xf32>
    tpu.vector_store %arg4[%c0_7, %c0_8], %13 {strides = array<i32>} : memref<8x128xf32, #tpu.memory_space<vmem>>, vector<8x128xf32>,
    %c0_9 = arith.constant 0 : index
    %c0_10 = arith.constant 0 : index
    %15 = vector.load %arg5[%c0_9, %c0_10] : memref<8x128xf32, #tpu.memory_space<vmem>>, vector<8x128xf32>
    %16 = vector.shape_cast %6 : vector<16x128xf32> to vector<2x8x128xf32>
    %cst_11 = arith.constant dense<0.000000e+00> : vector<8x128xf32>
    %17 = vector.multi_reduction <add>, %16, %cst_11 [0] : vector<2x8x128xf32> to vector<8x128xf32>
    %18 = arith.addf %15, %17 : vector<8x128xf32>
    %c0_12 = arith.constant 0 : index
    %c0_13 = arith.constant 0 : index
    %19 = vector.load %arg5[%c0_12, %c0_13] : memref<8x128xf32, #tpu.memory_space<vmem>>, vector<8x128xf32>
    tpu.vector_store %arg5[%c0_12, %c0_13], %18 {strides = array<i32>} : memref<8x128xf32, #tpu.memory_space<vmem>>, vector<8x128xf32>,
    return
  }
  func.func @transform_0(%arg0: i32, %arg1: i32) -> (i32, i32) {
    %c1_i32 = arith.constant 1 : i32
    %0 = arith.muli %arg0, %c1_i32 : i32
    %1 = arith.addi %0, %arg1 : i32
    %c0_i32 = arith.constant 0 : i32
    %c0_i32_0 = arith.constant 0 : i32
    return %1, %c0_i32 : i32, i32
  }
  func.func @transform_1(%arg0: i32, %arg1: i32) -> (i32, i32) {
    %c1_i32 = arith.constant 1 : i32
    %0 = arith.muli %arg0, %c1_i32 : i32
    %1 = arith.addi %0, %arg1 : i32
    %c0_i32 = arith.constant 0 : i32
    %c0_i32_0 = arith.constant 0 : i32
    return %1, %c0_i32 : i32, i32
  }
  func.func @transform_2(%arg0: i32, %arg1: i32) -> (i32, i32) {
    %c0_i32 = arith.constant 0 : i32
    %c0_i32_0 = arith.constant 0 : i32
    return %arg0, %c0_i32 : i32, i32
  }
  func.func @transform_3(%arg0: i32, %arg1: i32) -> (i32, i32) {
    %c0_i32 = arith.constant 0 : i32
    %c0_i32_0 = arith.constant 0 : i32
    return %arg0, %c0_i32 : i32, i32
  }
}

</mosaic_0001>

<bundles_post_ra>
// kernel: custom_loss.1
= control target key start
LH: loop header
LB: loop body
LE: loop exit
PB: predicated region body
PF: predicated region fallthrough
CT: control target
= control target key end

     0   :  { %s142_s0 = inlined_call_operand.vmem [shape: f32[16,128], index: 0, kind: input, shape index: {}]   ;;  %s143_s1 = inlined_call_operand.vmem [shape: f32[16,128], index: 1, kind: input, shape index: {}]   ;;  %s144_s3 = inlined_call_operand.vmem [shape: f32[8,128], index: 3, kind: output, shape index: {1}]   ;;  %s145_s2 = inlined_call_operand.vmem [shape: f32[8,128], index: 2, kind: output, shape index: {0}]  }
   0x1   :  { %v63_v0 = vld [vmem:[%s142_s0] sm:$0xff]  ;;  %v64_v1 = vld [vmem:[%s142_s0 + $0x8] sm:$0xff] }
   0x2   :  { %v65_v2 = vld [vmem:[%s143_s1] sm:$0xff]  ;;  %v66_v3 = vld [vmem:[%s143_s1 + $0x8] sm:$0xff] }
   0x3   :  { %v67_v4 = vadd.f32 0.033333335, %v65_v2  ;;  %v69_v5 = vsub.f32 %v63_v0, %v65_v2  ;;  %v68_v6 = vadd.f32 0.033333335, %v66_v3  ;;  %v70_v7 = vsub.f32 %v64_v1, %v66_v3 }
   0x5   :  { %v71_v8 = vmul.f32 %v69_v5, %v67_v4  ;;  %v72_v9 = vmul.f32 %v70_v7, %v68_v6  ;;  %v80_v10 = vadd.f32 %v68_v6, %v67_v4 }
   0x7   :  { %v73_v11 = vmul.f32 %v71_v8, %v69_v5  ;;  %v74_v12 = vmul.f32 %v72_v9, %v70_v7  ;;  %82 = vst [vmem:[%s144_s3] sm:$0xff] %v80_v10 }
   0x9   :  { %v76_v13 = vadd.f32 %v74_v12, %v73_v11 }
   0xb   :  { %78 = vst [vmem:[%s145_s2] sm:$0xff] %v76_v13 }

</bundles_post_ra>
